<compile_context>
chip_gen: v7x
topology: tpu7x:2x2x1
jax: 0.10.0
libtpu: 0.0.40
codegen_flags: <defaults>
</compile_context>

<pallas_src>
import jax
import jax.numpy as jnp
from jax.experimental import pallas as pl
from jax.experimental.pallas import tpu as pltpu


def _logistic_kernel(x_ref, o_ref):
    # Compute in f32 for exact-ish 1/(1+exp(-x)) semantics regardless of the
    # storage dtype. exp goes to the EUP; the approx reciprocal is a single
    # EUP op (separate VLIW slot), so VPU work per element is just neg + add.
    x = x_ref[...].astype(jnp.float32)
    denom = 1.0 + jnp.exp(-x)
    o_ref[...] = pl.reciprocal(denom, approx=True).astype(o_ref.dtype)


def _sublane_multiple(dtype):
    # sub-32-bit dtypes pack along sublanes: bf16 -> 16 rows, int8/fp8 -> 32
    itemsize = jnp.dtype(dtype).itemsize
    return {4: 8, 2: 16, 1: 32}.get(itemsize, 8)


# ~2 MiB per block: in+out double buffers = 4x block ~= 8 MiB, which fits the
# scoped-VMEM defaults of v5e (16 MiB) and v6e/v7x (32 MiB) with headroom.
_TARGET_BLOCK_BYTES = 2 * 1024 * 1024


def _logistic_2d(x2d):
    """Elementwise sigmoid over a lane-dense (rows, lanes) slab."""
    rows, lanes = x2d.shape
    dtype = x2d.dtype
    itemsize = jnp.dtype(dtype).itemsize
    sub = _sublane_multiple(dtype)

    if rows < sub:
        # A block equal to the full array dims is always legal.
        tile_rows = rows
    else:
        # Largest tile (multiple of the sublane pack) within the byte budget.
        tile_rows = min(rows, max(sub, _TARGET_BLOCK_BYTES // (lanes * itemsize)))
        tile_rows = max(sub, (tile_rows // sub) * sub)
        # v7x megacore: guarantee >= 2 grid steps so the "parallel" axis can
        # actually split across the two TensorCores. No-op on v5e/v6e.
        if rows >= 2 * sub:
            half_rows = max(sub, (pl.cdiv(rows, 2) // sub) * sub)
            tile_rows = min(tile_rows, half_rows)

    grid = (pl.cdiv(rows, tile_rows),)

    return pl.pallas_call(
        _logistic_kernel,
        out_shape=jax.ShapeDtypeStruct((rows, lanes), dtype),
        grid=grid,
        in_specs=[pl.BlockSpec((tile_rows, lanes), lambda i: (i, 0))],
        out_specs=pl.BlockSpec((tile_rows, lanes), lambda i: (i, 0)),
        compiler_params=pltpu.CompilerParams(
            dimension_semantics=("parallel",),
        ),
        cost_estimate=pl.CostEstimate(
            flops=2 * rows * lanes,
            transcendentals=rows * lanes,
            bytes_accessed=2 * rows * lanes * itemsize,
        ),
    )(x2d)


def _pick_lanes(n):
    """Largest multiple-of-128 divisor of n, capped at 4096; 0 if none."""
    for w in range(4096, 127, -128):
        if n % w == 0:
            return w
    return 0


def logistic_layer(x):
    """Applies elementwise sigmoid via a Pallas TPU kernel.

    Accepts any shape / float dtype; returns the same shape / dtype.
    """
    if not jnp.issubdtype(x.dtype, jnp.floating):
        raise TypeError("logistic_layer only supports floating-point inputs")

    orig_shape = x.shape
    n = x.size
    if n == 0:
        return x

    # Fast path: reshape directly into a lane-dense slab (no pad, no slice).
    lanes = _pick_lanes(n)
    if lanes:
        out2d = _logistic_2d(jnp.reshape(x, (n // lanes, lanes)))
        return jnp.reshape(out2d, orig_shape)

    # Ragged tail (n % 128 != 0) — essentially never happens for NCHW
    # activations. Run the kernel over the 128-aligned prefix and finish the
    # <128-element tail in plain jnp (avoids full-array pad + slice traffic).
    # TODO(synk): fold the tail into a masked partial last block instead.
    x_flat = jnp.reshape(x, (-1,))
    aligned = (n // 128) * 128
    tail = x_flat[aligned:].astype(jnp.float32)
    tail_out = (1.0 / (1.0 + jnp.exp(-tail))).astype(x.dtype)
    if aligned == 0:
        return jnp.reshape(tail_out, orig_shape)
    head2d = _logistic_2d(jnp.reshape(x_flat[:aligned], (aligned // 128, 128)))
    out = jnp.concatenate([jnp.reshape(head2d, (-1,)), tail_out])
    return jnp.reshape(out, orig_shape)


if __name__ == "__main__":
    key = jax.random.PRNGKey(0)
    # Small NCHW-like input consistent with typical module usage.
    x = jax.random.normal(key, (2, 4, 16, 16), dtype=jnp.float32)

    y = logistic_layer(x)
    y = jax.block_until_ready(y)

    # Sanity check against plain JAX reference. The approx EUP reciprocal
    # deviates from the exact f32 divide by at most a few 1e-4 absolute.
    y_ref = 1.0 / (1.0 + jnp.exp(-x))
    assert y.shape == x.shape and y.dtype == x.dtype
    assert jnp.allclose(y, y_ref, atol=1e-2, rtol=1e-2)

    print("KERNEL_OK")
</pallas_src>

<mosaic_0001>
module attributes {stable_mosaic.version = 11 : i64} {
  func.func @_logistic_kernel(%arg0: i32, %arg1: memref<1x2048xf32, #tpu.memory_space<vmem>>, %arg2: memref<1x2048xf32, #tpu.memory_space<vmem>>) attributes {dimension_semantics = [#tpu.dimension_semantics<parallel>], iteration_bounds = array<i64: 1>, scalar_prefetch = 0 : i64, scratch_operands = 0 : i64, tpu.core_type = #tpu.core_type<tc>, window_params = [{transform_indices = @transform_0, window_bounds = array<i64: 1, 2048>}, {transform_indices = @transform_1, window_bounds = array<i64: 1, 2048>}]} {
    %c0 = arith.constant 0 : index
    %c0_0 = arith.constant 0 : index
    %0 = vector.load %arg1[%c0, %c0_0] : memref<1x2048xf32, #tpu.memory_space<vmem>>, vector<1x2048xf32>
    %cst = arith.constant 0.000000e+00 : f32
    %1 = vector.broadcast %cst : f32 to vector<1x2048xf32>
    %2 = arith.subf %1, %0 : vector<1x2048xf32>
    %3 = math.exp %2 : vector<1x2048xf32>
    %cst_1 = arith.constant 1.000000e+00 : f32
    %4 = vector.broadcast %cst_1 : f32 to vector<1x2048xf32>
    %5 = arith.addf %4, %3 : vector<1x2048xf32>
    %6 = tpu.reciprocal %5 {approx = true} : vector<1x2048xf32> -> vector<1x2048xf32>
    %c0_2 = arith.constant 0 : index
    %c0_3 = arith.constant 0 : index
    %7 = vector.load %arg2[%c0_2, %c0_3] : memref<1x2048xf32, #tpu.memory_space<vmem>>, vector<1x2048xf32>
    tpu.vector_store %arg2[%c0_2, %c0_3], %6 {strides = array<i32>} : memref<1x2048xf32, #tpu.memory_space<vmem>>, vector<1x2048xf32>,
    return
  }
  func.func @transform_0(%arg0: i32) -> (i32, i32) {
    %c0_i32 = arith.constant 0 : i32
    %c0_i32_0 = arith.constant 0 : i32
    return %arg0, %c0_i32 : i32, i32
  }
  func.func @transform_1(%arg0: i32) -> (i32, i32) {
    %c0_i32 = arith.constant 0 : i32
    %c0_i32_0 = arith.constant 0 : i32
    return %arg0, %c0_i32 : i32, i32
  }
}

</mosaic_0001>

<bundles_post_ra>
// kernel: tpu_custom_call.1
= control target key start
LH: loop header
LB: loop body
LE: loop exit
PB: predicated region body
PF: predicated region fallthrough
CT: control target
= control target key end

     0   :  { %6 = vsyncpa [#allocation3], 0  ;;  %s144_s0 = inlined_call_operand.hbm [shape: f32[1,2048], index: 0, kind: input, shape index: {}]   ;;  %s145_s1 = inlined_call_operand.hbm [shape: f32[1,2048], index: 1, kind: output, shape index: {}]  }
   0x1   :  { %7 = vsyncpa [#allocation4], 0  ;;  %s108_s6 = smov [#allocation2]   ;;  %s60_s10 = scalar_lea.hbm %s144_s0, 256 }
   0x2   :  { %s14_s7 = sshll.u32 %s108_s6, 4  ;;  %p61_p0 = scmp.ne.s32.totalorder %s144_s0, %s60_s10  ;;  %s15_s7 = int_to_ptr.vmem [resolvable:$true] %s14_s7 }
   0x3   :  { %p64_p1 = scmp.lt.u32.totalorder %s60_s10, %s144_s0 }
   0x5   :  { %p66_p2 = pnand %p64_p1, %p61_p0 }
   0x7   :  { %69 = shalt.err (!%p66_p2)
}
   0x8   :  { %s70_s15 = scalar_lea.vmem %s15_s7, 256  ;;  %p75_p4 = scmp.lt.s32.totalorder %s15_s7, %s15_s7 }
   0x9   :  { %p71_p3 = scmp.ne.s32.totalorder %s15_s7, %s70_s15  ;;  %p76_p5 = scmp.lt.s32.totalorder %s70_s15, %s70_s15 }
   0xb   :  { %p77_p6 = por %p76_p5, %p75_p4 }
   0xd   :  { %p78_p7 = pnand %p77_p6, %p71_p3 }
   0xf   :  { %81 = shalt.err (!%p78_p7)
}
  0x10   :  { %17 = dma.hbm_to_vmem [thread:$0]  %s144_s0, 256, %s15_s7, [#allocation3]  }
  0x11   :  { %104 = dma.done.wait [#allocation3], 256  }
  0x12   :  { %105 = vsyncadd [#allocation3], 4294967040  ;;  %v21_v0 = vld [vmem:[#allocation2] sm:$0xff]  ;;  %v22_v1 = vld [vmem:[#allocation2 + $0x8] sm:$0xff]  ;;  %s109_s18 = smov [#allocation5]  }
  0x13   :  { %v23_v2 = vsub.f32 0.0, %v21_v0  ;;  %v24_v3 = vsub.f32 0.0, %v22_v1  ;;  %s41_s19 = sshll.u32 %s109_s18, 4  ;;  %s42_s19 = int_to_ptr.vmem [resolvable:$true] %s41_s19 }
  0x14   :  { %s82_s0 = scalar_lea.vmem %s42_s19, 256  ;;  %p87_p9 = scmp.lt.s32.totalorder %s42_s19, %s42_s19 }
  0x15   :  { %v25_v4 = vmul.f32 1.442695, %v23_v2  ;;  %v27_v5 = vmul.f32 1.442695, %v24_v3  ;;  %p83_p8 = scmp.ne.s32.totalorder %s42_s19, %s82_s0  ;;  %p88_p10 = scmp.lt.s32.totalorder %s82_s0, %s82_s0 }
  0x17   :  { %52 = vpow2.f32 %v25_v4  ;;  %p89_p11 = por %p88_p10, %p87_p9 }
  0x18   :  { %54 = vpow2.f32 %v27_v5 }
  0x19   :  { %p90_p12 = pnand %p89_p11, %p83_p8 }
  0x21   :  { %v53_v6 = vpop.eup %52 }
  0x22   :  { %v55_v7 = vpop.eup %54  ;;  %v29_v8 = vadd.f32 1.0, %v53_v6 }
  0x23   :  { %v30_v9 = vadd.f32 1.0, %v55_v7 }
  0x24   :  { %56 = vrcp.f32 %v29_v8 }
  0x25   :  { %58 = vrcp.f32 %v30_v9 }
  0x2e   :  { %v57_v10 = vpop.eup %56 }
  0x2f   :  { %v59_v11 = vpop.eup %58  ;;  %33 = vst [vmem:[#allocation5] sm:$0xff] %v57_v10 }
  0x30   :  { %34 = vst [vmem:[#allocation5 + $0x8] sm:$0xff] %v59_v11 }
  0x31   :  { %93 = shalt.err (!%p90_p12)
}
  0x32   :  { %s94_s22 = scalar_lea.hbm %s145_s1, 256 }
  0x33   :  { %p95_p13 = scmp.ne.s32.totalorder %s145_s1, %s94_s22  ;;  %p98_p0 = scmp.lt.u32.totalorder %s94_s22, %s145_s1 }
  0x35   :  { %p100_p1 = pnand %p98_p0, %p95_p13 }
  0x37   :  { %103 = shalt.err (!%p100_p1)
}
  0x38   :  { %44 = dma.vmem_to_hbm [thread:$0]  %s42_s19, 256, %s145_s1, [#allocation4]  }
  0x39   :  { %106 = dma.done.wait [#allocation4], 256  }
  0x3a   :  { %107 = vsyncadd [#allocation4], 4294967040 }
  0x3b   :  { %48 = vsyncpa [#allocation3], 1 }
  0x3c   :  { %49 = vsyncpa [#allocation4], 1 }

</bundles_post_ra>
